<compile_context>
chip_gen: v7x
topology: tpu7x:2x2x1
jax: 0.10.0
libtpu: 0.0.40
codegen_flags: <defaults>
</compile_context>

<pallas_src>
import math

import jax
import jax.numpy as jnp
from jax.experimental import pallas as pl
from jax.experimental.pallas import tpu as pltpu


def dqn_kernel(x_ref,
               w1_ref, b1_ref,
               w2_ref, b2_ref,
               w3_ref, b3_ref,
               w4_ref, b4_ref,
               out_ref):
    # bf16 MXU inputs, f32 accumulation.  Hidden activations are stored bf16
    # immediately after bias+ReLU (numerically identical to re-casting each
    # layer's input before the dot, but halves vreg/VMEM pressure).
    h = jnp.dot(x_ref[...].astype(jnp.bfloat16), w1_ref[...],
                preferred_element_type=jnp.float32)
    h = jnp.maximum(h + b1_ref[...], 0.0).astype(jnp.bfloat16)

    h = jnp.dot(h, w2_ref[...], preferred_element_type=jnp.float32)
    h = jnp.maximum(h + b2_ref[...], 0.0).astype(jnp.bfloat16)

    h = jnp.dot(h, w3_ref[...], preferred_element_type=jnp.float32)
    h = jnp.maximum(h + b3_ref[...], 0.0).astype(jnp.bfloat16)

    h = jnp.dot(h, w4_ref[...], preferred_element_type=jnp.float32)
    out_ref[...] = (h + b4_ref[...]).astype(out_ref.dtype)


def _round_up(x, m):
    return (x + m - 1) // m * m


def dqn_forward(x, params, *, tile_b_max=1024):
    """x: [B, n_inputs] f32.  params: list of (W [in,out] bf16, b [1,out] f32)."""
    (w1, b1), (w2, b2), (w3, b3), (w4, b4) = params
    B, n_in = x.shape
    n_actions = w4.shape[1]

    # Balanced batch tiling: pick the number of tiles first, then a tile size
    # rounded up to a sublane multiple of 8, so padding is capped at <= 7 rows
    # per tile (instead of up to tile_b-1 when rounding B to a fixed tile).
    num_tiles = pl.cdiv(B, tile_b_max)
    if B >= 16:
        # >= 2 grid steps whenever possible so dimension_semantics="parallel"
        # can shard the batch across v7x's two TensorCores.
        num_tiles = max(num_tiles, 2)
    tile_b = _round_up(pl.cdiv(B, num_tiles), 8)
    padded_B = num_tiles * tile_b
    if padded_B != B:
        x = jnp.pad(x, ((0, padded_B - B), (0, 0)))
    grid = (num_tiles,)

    def batch_spec(cols):
        return pl.BlockSpec((tile_b, cols), lambda i: (i, 0))

    def resident_spec(arr):
        # Constant block index -> weight/bias stays VMEM-resident across the grid.
        return pl.BlockSpec(arr.shape, lambda i: (0, 0))

    # Output block is (tile_b, n_actions): the last dim equals the full array
    # dim, so the block is legal and the writeback stays contiguous in HBM —
    # no 128-lane zero padding, no epilogue slice of a 32x-inflated array.
    out = pl.pallas_call(
        dqn_kernel,
        out_shape=jax.ShapeDtypeStruct((padded_B, n_actions), jnp.float32),
        grid=grid,
        in_specs=[
            batch_spec(n_in),
            resident_spec(w1), resident_spec(b1),
            resident_spec(w2), resident_spec(b2),
            resident_spec(w3), resident_spec(b3),
            resident_spec(w4), resident_spec(b4),
        ],
        out_specs=batch_spec(n_actions),
        compiler_params=pltpu.CompilerParams(
            dimension_semantics=("parallel",),   # megacore sharding on v7x
            vmem_limit_bytes=32 * 1024 * 1024,   # safe on all generations
        ),
    )(x, w1, b1, w2, b2, w3, b3, w4, b4)

    return out[:B]


def init_linear(key, fan_in, fan_out):
    """PyTorch-style (kaiming uniform) init; W stored [in, out] in bf16, b f32."""
    kw, kb = jax.random.split(key)
    bound = 1.0 / math.sqrt(fan_in)
    w = jax.random.uniform(kw, (fan_in, fan_out), jnp.float32, -bound, bound)
    b = jax.random.uniform(kb, (1, fan_out), jnp.float32, -bound, bound)
    return w.astype(jnp.bfloat16), b


def reference_forward(x, params):
    """Pure-JAX reference using the same mixed precision as the kernel."""
    h = x.astype(jnp.bfloat16)
    for i, (w, b) in enumerate(params):
        h = jnp.dot(h, w, preferred_element_type=jnp.float32) + b
        if i < len(params) - 1:
            h = jnp.maximum(h, 0.0).astype(jnp.bfloat16)
    return h


if __name__ == "__main__":
    # Small shapes consistent with the module: flat state vector -> Q values.
    batch = 8
    n_inputs = 16
    n_actions = 4

    root = jax.random.PRNGKey(0)
    kx, k1, k2, k3, k4 = jax.random.split(root, 5)

    x = jax.random.normal(kx, (batch, n_inputs), jnp.float32)

    params = [
        init_linear(k1, n_inputs, 512),
        init_linear(k2, 512, 128),
        init_linear(k3, 128, 32),
        init_linear(k4, 32, n_actions),
    ]

    out = dqn_forward(x, params)
    out = jax.block_until_ready(out)

    ref = reference_forward(x, params)
    assert out.shape == (batch, n_actions)
    assert jnp.allclose(out, ref, atol=1e-2, rtol=1e-2)

    # Also exercise a multi-tile, megacore-friendly batch (2+ grid steps,
    # balanced tiles with a non-multiple-of-8 batch).
    big_B = 1030
    xb = jax.random.normal(jax.random.PRNGKey(1), (big_B, n_inputs), jnp.float32)
    out_big = jax.block_until_ready(dqn_forward(xb, params))
    ref_big = reference_forward(xb, params)
    assert out_big.shape == (big_B, n_actions)
    assert jnp.allclose(out_big, ref_big, atol=1e-2, rtol=1e-2)

    print("KERNEL_OK")
</pallas_src>

<mosaic_0001>
module attributes {stable_mosaic.version = 11 : i64} {
  func.func @dqn_kernel(%arg0: i32, %arg1: memref<8x16xf32, #tpu.memory_space<vmem>>, %arg2: memref<16x512xbf16, #tpu.memory_space<vmem>>, %arg3: memref<1x512xf32, #tpu.memory_space<vmem>>, %arg4: memref<512x128xbf16, #tpu.memory_space<vmem>>, %arg5: memref<1x128xf32, #tpu.memory_space<vmem>>, %arg6: memref<128x32xbf16, #tpu.memory_space<vmem>>, %arg7: memref<1x32xf32, #tpu.memory_space<vmem>>, %arg8: memref<32x4xbf16, #tpu.memory_space<vmem>>, %arg9: memref<1x4xf32, #tpu.memory_space<vmem>>, %arg10: memref<8x4xf32, #tpu.memory_space<vmem>>) attributes {dimension_semantics = [#tpu.dimension_semantics<parallel>], iteration_bounds = array<i64: 1>, scalar_prefetch = 0 : i64, scratch_operands = 0 : i64, tpu.core_type = #tpu.core_type<tc>, window_params = [{transform_indices = @transform_0, window_bounds = array<i64: 8, 16>}, {pipeline_mode = #tpu.pipeline_mode<synchronous>, transform_indices = @transform_1, window_bounds = array<i64: 16, 512>}, {pipeline_mode = #tpu.pipeline_mode<synchronous>, transform_indices = @transform_2, window_bounds = array<i64: 1, 512>}, {pipeline_mode = #tpu.pipeline_mode<synchronous>, transform_indices = @transform_3, window_bounds = array<i64: 512, 128>}, {pipeline_mode = #tpu.pipeline_mode<synchronous>, transform_indices = @transform_4, window_bounds = array<i64: 1, 128>}, {pipeline_mode = #tpu.pipeline_mode<synchronous>, transform_indices = @transform_5, window_bounds = array<i64: 128, 32>}, {pipeline_mode = #tpu.pipeline_mode<synchronous>, transform_indices = @transform_6, window_bounds = array<i64: 1, 32>}, {pipeline_mode = #tpu.pipeline_mode<synchronous>, transform_indices = @transform_7, window_bounds = array<i64: 32, 4>}, {pipeline_mode = #tpu.pipeline_mode<synchronous>, transform_indices = @transform_8, window_bounds = array<i64: 1, 4>}, {transform_indices = @transform_9, window_bounds = array<i64: 8, 4>}]} {
    %c0 = arith.constant 0 : index
    %c0_0 = arith.constant 0 : index
    %0 = vector.load %arg1[%c0, %c0_0] : memref<8x16xf32, #tpu.memory_space<vmem>>, vector<8x16xf32>
    %1 = arith.truncf %0 : vector<8x16xf32> to vector<8x16xbf16>
    %c0_1 = arith.constant 0 : index
    %c0_2 = arith.constant 0 : index
    %2 = vector.load %arg2[%c0_1, %c0_2] : memref<16x512xbf16, #tpu.memory_space<vmem>>, vector<16x512xbf16>
    %cst = arith.constant dense<0.000000e+00> : vector<8x512xf32>
    %3 = tpu.matmul %1, %2, %cst {dimension_numbers = #tpu.dot_dimension_numbers<[1], [0], [0], [1], [0, 0, 1, 1], [], []>} : vector<8x16xbf16>, vector<16x512xbf16>, vector<8x512xf32> -> vector<8x512xf32>
    %c0_3 = arith.constant 0 : index
    %c0_4 = arith.constant 0 : index
    %4 = vector.load %arg3[%c0_3, %c0_4] : memref<1x512xf32, #tpu.memory_space<vmem>>, vector<1x512xf32>
    %5 = vector.broadcast %4 : vector<1x512xf32> to vector<8x512xf32>
    %6 = arith.addf %3, %5 : vector<8x512xf32>
    %cst_5 = arith.constant 0.000000e+00 : f32
    %7 = vector.broadcast %cst_5 : f32 to vector<8x512xf32>
    %8 = arith.maximumf %6, %7 : vector<8x512xf32>
    %9 = arith.truncf %8 : vector<8x512xf32> to vector<8x512xbf16>
    %c0_6 = arith.constant 0 : index
    %c0_7 = arith.constant 0 : index
    %10 = vector.load %arg4[%c0_6, %c0_7] : memref<512x128xbf16, #tpu.memory_space<vmem>>, vector<512x128xbf16>
    %cst_8 = arith.constant dense<0.000000e+00> : vector<8x128xf32>
    %11 = tpu.matmul %9, %10, %cst_8 {dimension_numbers = #tpu.dot_dimension_numbers<[1], [0], [0], [1], [0, 0, 1, 1], [], []>} : vector<8x512xbf16>, vector<512x128xbf16>, vector<8x128xf32> -> vector<8x128xf32>
    %c0_9 = arith.constant 0 : index
    %c0_10 = arith.constant 0 : index
    %12 = vector.load %arg5[%c0_9, %c0_10] : memref<1x128xf32, #tpu.memory_space<vmem>>, vector<1x128xf32>
    %13 = vector.broadcast %12 : vector<1x128xf32> to vector<8x128xf32>
    %14 = arith.addf %11, %13 : vector<8x128xf32>
    %cst_11 = arith.constant 0.000000e+00 : f32
    %15 = vector.broadcast %cst_11 : f32 to vector<8x128xf32>
    %16 = arith.maximumf %14, %15 : vector<8x128xf32>
    %17 = arith.truncf %16 : vector<8x128xf32> to vector<8x128xbf16>
    %c0_12 = arith.constant 0 : index
    %c0_13 = arith.constant 0 : index
    %18 = vector.load %arg6[%c0_12, %c0_13] : memref<128x32xbf16, #tpu.memory_space<vmem>>, vector<128x32xbf16>
    %cst_14 = arith.constant dense<0.000000e+00> : vector<8x32xf32>
    %19 = tpu.matmul %17, %18, %cst_14 {dimension_numbers = #tpu.dot_dimension_numbers<[1], [0], [0], [1], [0, 0, 1, 1], [], []>} : vector<8x128xbf16>, vector<128x32xbf16>, vector<8x32xf32> -> vector<8x32xf32>
    %c0_15 = arith.constant 0 : index
    %c0_16 = arith.constant 0 : index
    %20 = vector.load %arg7[%c0_15, %c0_16] : memref<1x32xf32, #tpu.memory_space<vmem>>, vector<1x32xf32>
    %21 = vector.broadcast %20 : vector<1x32xf32> to vector<8x32xf32>
    %22 = arith.addf %19, %21 : vector<8x32xf32>
    %cst_17 = arith.constant 0.000000e+00 : f32
    %23 = vector.broadcast %cst_17 : f32 to vector<8x32xf32>
    %24 = arith.maximumf %22, %23 : vector<8x32xf32>
    %25 = arith.truncf %24 : vector<8x32xf32> to vector<8x32xbf16>
    %c0_18 = arith.constant 0 : index
    %c0_19 = arith.constant 0 : index
    %26 = vector.load %arg8[%c0_18, %c0_19] : memref<32x4xbf16, #tpu.memory_space<vmem>>, vector<32x4xbf16>
    %cst_20 = arith.constant dense<0.000000e+00> : vector<8x4xf32>
    %27 = tpu.matmul %25, %26, %cst_20 {dimension_numbers = #tpu.dot_dimension_numbers<[1], [0], [0], [1], [0, 0, 1, 1], [], []>} : vector<8x32xbf16>, vector<32x4xbf16>, vector<8x4xf32> -> vector<8x4xf32>
    %c0_21 = arith.constant 0 : index
    %c0_22 = arith.constant 0 : index
    %28 = vector.load %arg9[%c0_21, %c0_22] : memref<1x4xf32, #tpu.memory_space<vmem>>, vector<1x4xf32>
    %29 = vector.broadcast %28 : vector<1x4xf32> to vector<8x4xf32>
    %30 = arith.addf %27, %29 : vector<8x4xf32>
    %c0_23 = arith.constant 0 : index
    %c0_24 = arith.constant 0 : index
    %31 = vector.load %arg10[%c0_23, %c0_24] : memref<8x4xf32, #tpu.memory_space<vmem>>, vector<8x4xf32>
    tpu.vector_store %arg10[%c0_23, %c0_24], %30 {strides = array<i32>} : memref<8x4xf32, #tpu.memory_space<vmem>>, vector<8x4xf32>,
    return
  }
  func.func @transform_0(%arg0: i32) -> (i32, i32) {
    %c0_i32 = arith.constant 0 : i32
    %c0_i32_0 = arith.constant 0 : i32
    return %arg0, %c0_i32 : i32, i32
  }
  func.func @transform_1(%arg0: i32) -> (i32, i32) {
    %c0_i32 = arith.constant 0 : i32
    %c0_i32_0 = arith.constant 0 : i32
    %c0_i32_1 = arith.constant 0 : i32
    return %c0_i32, %c0_i32_0 : i32, i32
  }
  func.func @transform_2(%arg0: i32) -> (i32, i32) {
    %c0_i32 = arith.constant 0 : i32
    %c0_i32_0 = arith.constant 0 : i32
    %c0_i32_1 = arith.constant 0 : i32
    return %c0_i32, %c0_i32_0 : i32, i32
  }
  func.func @transform_3(%arg0: i32) -> (i32, i32) {
    %c0_i32 = arith.constant 0 : i32
    %c0_i32_0 = arith.constant 0 : i32
    %c0_i32_1 = arith.constant 0 : i32
    return %c0_i32, %c0_i32_0 : i32, i32
  }
  func.func @transform_4(%arg0: i32) -> (i32, i32) {
    %c0_i32 = arith.constant 0 : i32
    %c0_i32_0 = arith.constant 0 : i32
    %c0_i32_1 = arith.constant 0 : i32
    return %c0_i32, %c0_i32_0 : i32, i32
  }
  func.func @transform_5(%arg0: i32) -> (i32, i32) {
    %c0_i32 = arith.constant 0 : i32
    %c0_i32_0 = arith.constant 0 : i32
    %c0_i32_1 = arith.constant 0 : i32
    return %c0_i32, %c0_i32_0 : i32, i32
  }
  func.func @transform_6(%arg0: i32) -> (i32, i32) {
    %c0_i32 = arith.constant 0 : i32
    %c0_i32_0 = arith.constant 0 : i32
    %c0_i32_1 = arith.constant 0 : i32
    return %c0_i32, %c0_i32_0 : i32, i32
  }
  func.func @transform_7(%arg0: i32) -> (i32, i32) {
    %c0_i32 = arith.constant 0 : i32
    %c0_i32_0 = arith.constant 0 : i32
    %c0_i32_1 = arith.constant 0 : i32
    return %c0_i32, %c0_i32_0 : i32, i32
  }
  func.func @transform_8(%arg0: i32) -> (i32, i32) {
    %c0_i32 = arith.constant 0 : i32
    %c0_i32_0 = arith.constant 0 : i32
    %c0_i32_1 = arith.constant 0 : i32
    return %c0_i32, %c0_i32_0 : i32, i32
  }
  func.func @transform_9(%arg0: i32) -> (i32, i32) {
    %c0_i32 = arith.constant 0 : i32
    %c0_i32_0 = arith.constant 0 : i32
    return %arg0, %c0_i32 : i32, i32
  }
}

</mosaic_0001>

<bundles_post_ra>
// kernel: tpu_custom_call.1
= control target key start
LH: loop header
LB: loop body
LE: loop exit
PB: predicated region body
PF: predicated region fallthrough
CT: control target
= control target key end

     0   :  { %14 = vsyncpa [#allocation3], 0  ;;  %s935_s30 = smov [#allocation2]   ;;  %s1077_s0 = inlined_call_operand.vmem [shape: f32[8,16], index: 0, kind: input, shape index: {}]   ;;  %s1078_s1 = inlined_call_operand.vmem [shape: bf16[16,512], index: 1, kind: input, shape index: {}]   ;;  %s1079_s2 = inlined_call_operand.vmem [shape: f32[1,512], index: 2, kind: input, shape index: {}]   ;;  %s1080_s3 = inlined_call_operand.hbm [shape: bf16[512,128], index: 3, kind: input, shape index: {}]   ;;  %s1081_s4 = inlined_call_operand.vmem [shape: f32[1,128], index: 4, kind: input, shape index: {}]   ;;  %s1082_s5 = inlined_call_operand.vmem [shape: bf16[128,32], index: 5, kind: input, shape index: {}]   ;;  %s1083_s6 = inlined_call_operand.vmem [shape: f32[1,32], index: 6, kind: input, shape index: {}]   ;;  %s1084_s7 = inlined_call_operand.vmem [shape: bf16[32,4], index: 7, kind: input, shape index: {}]   ;;  %s1085_s8 = inlined_call_operand.vmem [shape: f32[1,4], index: 8, kind: input, shape index: {}]   ;;  %s1086_s9 = inlined_call_operand.vmem [shape: f32[8,4], index: 9, kind: output, shape index: {}]  }
   0x1   :  { %s26_s10 = sshll.u32 %s935_s30, 4  ;;  %s911_s13 = scalar_lea.hbm %s1080_s3, 4096  ;;  %s27_s10 = int_to_ptr.vmem [resolvable:$true] %s26_s10 }
   0x2   :  { %p912_p0 = scmp.ne.s32.totalorder %s1080_s3, %s911_s13  ;;  %p915_p1 = scmp.lt.u32.totalorder %s911_s13, %s1080_s3 }
   0x4   :  { %p917_p2 = pnand %p915_p1, %p912_p0 }
   0x6   :  { %920 = shalt.err (!%p917_p2)
}
   0x7   :  { %s921_s18 = scalar_lea.vmem %s27_s10, 4096  ;;  %p926_p4 = scmp.lt.s32.totalorder %s27_s10, %s27_s10 }
   0x8   :  { %p922_p3 = scmp.ne.s32.totalorder %s27_s10, %s921_s18  ;;  %p927_p5 = scmp.lt.s32.totalorder %s921_s18, %s921_s18 }
   0xa   :  { %p928_p6 = por %p927_p5, %p926_p4 }
   0xc   :  { %p929_p7 = pnand %p928_p6, %p922_p3 }
   0xe   :  { %932 = shalt.err (!%p929_p7)
}
   0xf   :  { %s936_s19 = smov 64   ;;  %s937_s20 = smov 4  }
  0x10   :  { %32 = dma.hbm_to_vmem [thread:$0]  %s1080_s3, 4096, %s27_s10, [#allocation3], %s936_s19, %s936_s19, %s937_s20  }
  0x11   :  { %933 = dma.done.wait [#allocation3], 4096  }
  0x12   :  { %934 = vsyncadd [#allocation3], 4294963200  ;;  %v938_v0 = vmov 0   ;;  %v863_v1 = vld [vmem:[%s1078_s1 + $0x4] ss:$16 sps:$4 sm:$0xff]   ;;  %vm95_vm0 = vcmask 130048   ;;  %v55_v40 = vlaneseq }
  0x13   :  { %131 = vmatprep.mubr.bf16.mxu1 %v938_v0  ;;  %v865_v2 = vld [vmem:[%s1078_s1] ss:$16 sps:$4 sm:$0xff]   ;;  %99 = vmatprep.subr.bf16.mxu1 %v863_v1  ;;  %v866_v5 = vld [vmem:[%s1078_s1 + $0x8] ss:$16 sps:$4 sm:$0xff]   ;;  %v868_v6 = vld [vmem:[%s1078_s1 + $0xc] ss:$16 sps:$4 sm:$0xff]  }
  0x14   :  { %v47_v3 = vld [vmem:[%s1077_s0] sm:$0xff]  ;;  %100 = vmatpush1.bf16.msra.mxu1 %v865_v2  ;;  %v871_v9 = vld [vmem:[#allocation2 + $0x48] sm:$0xff]   ;;  %v873_v11 = vld [vmem:[#allocation2 + $0x50] sm:$0xff]   ;;  %v939_v39 = vmov 0.0   ;;  %v56_v41 = vshrl.u32 %v55_v40, 7  ;;  %vm940_vm1 = vmmov 0  }
  0x15   :  { %v48_v4 = vpack.c.bf16 %v47_v3, %v47_v3  ;;  %v869_v7 = vld [vmem:[#allocation2 + $0x40] sm:$0xff]   ;;  %140 = vmatprep.subr.bf16.mxu1 %v868_v6  ;;  %v872_v10 = vld [vmem:[#allocation2 + $0x8] sm:$0xff]   ;;  %v875_v13 = vld [vmem:[#allocation2 + $0x10] sm:$0xff]   ;;  %vm670_vm2 = vcmask 261120   ;;  %vm714_vm3 = vcmask 31744  }
  0x16   :  { %v870_v8 = vld [vmem:[#allocation2] sm:$0xff]   ;;  %773 = vmatprep.subr.bf16.mxu0 %v869_v7  ;;  %v877_v15 = vld [vmem:[#allocation2 + $0x58] sm:$0xff]   ;;  %v878_v16 = vld [vmem:[#allocation2 + $0xc8] sm:$0xff]   ;;  %v57_v42 = vsub.s32 0, %v56_v41  ;;  %v61_v44 = vsub.s32 1, %v56_v41  ;;  %v65_v50 = vsub.s32 2, %v56_v41 }
  0x17   :  { %725 = vmatmul.mubr.msk.bf16.vlgmr.msra.gmra.mrb[0].mxu1 %vm95_vm0, %v48_v4  ;;  %774 = vmatpush3.bf16.msra.mxu0 %v870_v8  ;;  %v874_v12 = vld [vmem:[#allocation2 + $0xc0] sm:$0xff]   ;;  %v879_v17 = vld [vmem:[#allocation2 + $0x18] sm:$0xff]   ;;  %v880_v18 = vld [vmem:[#allocation2 + $0x88] sm:$0xff]   ;;  %v69_v53 = vsub.s32 3, %v56_v41 }
  0x18   :  { %141 = vmatpush1.bf16.msra.mxu1 %v866_v5  ;;  %172 = vmatprep.mubr.bf16.mxu1 %v938_v0  ;;  %v876_v14 = vld [vmem:[#allocation2 + $0x80] sm:$0xff]   ;;  %v882_v20 = vld [vmem:[#allocation2 + $0xd0] sm:$0xff]   ;;  %v885_v23 = vld [vmem:[#allocation2 + $0x68] sm:$0xff]  }
  0x19   :  { %775 = vmatprep.subr.bf16.mxu0 %v871_v9  ;;  %795 = vmatprep.subr.bf16.mxu1 %v874_v12  ;;  %v881_v19 = vld [vmem:[#allocation2 + $0x60] sm:$0xff]   ;;  %v884_v22 = vld [vmem:[#allocation2 + $0x90] sm:$0xff]   ;;  %v886_v24 = vld [vmem:[#allocation2 + $0xd8] sm:$0xff]  }
  0x1a   :  { %v883_v21 = vld [vmem:[#allocation2 + $0x20] sm:$0xff]   ;;  %v887_v25 = vld [vmem:[#allocation2 + $0x28] sm:$0xff]   ;;  %v888_v26 = vld [vmem:[#allocation2 + $0x98] sm:$0xff]  }
  0x1b   :  { %776 = vmatpush3.bf16.msra.mxu0 %v872_v10  ;;  %v889_v27 = vld [vmem:[#allocation2 + $0x70] sm:$0xff]   ;;  %v890_v28 = vld [vmem:[#allocation2 + $0xe0] sm:$0xff]   ;;  %v893_v31 = vld [vmem:[#allocation2 + $0x78] sm:$0xff]  }
  0x1c   :  { %777 = vmatprep.subr.bf16.mxu0 %v873_v11  ;;  %v891_v29 = vld [vmem:[#allocation2 + $0x30] sm:$0xff]   ;;  %v892_v30 = vld [vmem:[#allocation2 + $0xa0] sm:$0xff]   ;;  %v894_v32 = vld [vmem:[#allocation2 + $0xe8] sm:$0xff]  }
  0x1d   :  { %v895_v33 = vld [vmem:[#allocation2 + $0x38] sm:$0xff]   ;;  %v896_v34 = vld [vmem:[#allocation2 + $0xa8] sm:$0xff]   ;;  %v897_v35 = vld [vmem:[#allocation2 + $0xf0] sm:$0xff]  }
  0x1e   :  { %v898_v36 = vld [vmem:[#allocation2 + $0xb0] sm:$0xff]   ;;  %v899_v37 = vld [vmem:[#allocation2 + $0xf8] sm:$0xff]   ;;  %v53_v43 = vld [vmem:[%s1079_s2] sm:$0xf] }
  0x1f   :  { %726 = vmatmul.mubr.msk.bf16.vlgmr.msra.gmra.mrb[4].mxu1 %vm95_vm0, %v48_v4  ;;  %778 = vmatpush3.bf16.msra.mxu0 %v875_v13  ;;  %v900_v38 = vld [vmem:[#allocation2 + $0xb8] sm:$0xff]   ;;  %v58_v45 = vrot.slane %v53_v43, %v57_v42  ;;  %v62_v46 = vrot.slane %v53_v43, %v61_v44  ;;  %v66_v57 = vrot.slane %v53_v43, %v65_v50  ;;  %v901_v60 = vld [vmem:[%s1082_s5] sm:$0xff]   ;;  %v902_v3 = vld [vmem:[%s1082_s5 + $0x8] sm:$0xff]  }
  0x20   :  { %796 = vmatpush3.bf16.msra.mxu1 %v876_v14  ;;  %779 = vmatprep.subr.bf16.mxu0 %v877_v15  ;;  %v70_v59 = vrot.slane %v53_v43, %v69_v53  ;;  %v903_v8 = vld [vmem:[%s1082_s5 + $0x10] sm:$0xff]   ;;  %v904_v10 = vld [vmem:[%s1082_s5 + $0x18] sm:$0xff]   ;;  %v905_v11 = vld [vmem:[%s1082_s5 + $0x20] sm:$0xff]  }
  0x21   :  { %797 = vmatprep.subr.bf16.mxu1 %v878_v16  ;;  %v906_v12 = vld [vmem:[%s1082_s5 + $0x28] sm:$0xff]   ;;  %v907_v13 = vld [vmem:[%s1082_s5 + $0x30] sm:$0xff]   ;;  %v908_v14 = vld [vmem:[%s1082_s5 + $0x38] sm:$0xff]  }
  0x23   :  { %780 = vmatpush3.bf16.msra.mxu0 %v879_v17 }
  0x24   :  { %798 = vmatpush3.bf16.msra.mxu1 %v880_v18  ;;  %781 = vmatprep.subr.bf16.mxu0 %v881_v19 }
  0x25   :  { %799 = vmatprep.subr.bf16.mxu1 %v882_v20  ;;  %v727_v20 = vld [vmem:[%s1081_s4] ss:$0 sm:$0xff] }
  0x27   :  { %782 = vmatpush3.bf16.msra.mxu0 %v883_v21 }
  0x28   :  { %800 = vmatpush3.bf16.msra.mxu1 %v884_v22  ;;  %783 = vmatprep.subr.bf16.mxu0 %v885_v23 }
  0x29   :  { %801 = vmatprep.subr.bf16.mxu1 %v886_v24 }
  0x2b   :  { %784 = vmatpush3.bf16.msra.mxu0 %v887_v25 }
  0x2c   :  { %802 = vmatpush3.bf16.msra.mxu1 %v888_v26  ;;  %785 = vmatprep.subr.bf16.mxu0 %v889_v27 }
  0x2d   :  { %803 = vmatprep.subr.bf16.mxu1 %v890_v28 }
  0x2f   :  { %786 = vmatpush3.bf16.msra.mxu0 %v891_v29 }
  0x30   :  { %804 = vmatpush3.bf16.msra.mxu1 %v892_v30  ;;  %787 = vmatprep.subr.bf16.mxu0 %v893_v31  ;;  %v909_v30 = vld [vmem:[%s1084_s7] sm:$0xff]   ;;  %v910_v31 = vld [vmem:[%s1084_s7 + $0x8] sm:$0xff]  }
  0x31   :  { %805 = vmatprep.subr.bf16.mxu1 %v894_v32  ;;  %v760_v32 = vld [vmem:[%s1083_s6] ss:$0 sm:$0xff] }
  0x33   :  { %788 = vmatpush3.bf16.msra.mxu0 %v895_v33 }
  0x34   :  { %806 = vmatpush3.bf16.msra.mxu1 %v896_v34  ;;  %829 = vmatprep.subr.bf16.mxu0 %v939_v39 }
  0x35   :  { %807 = vmatprep.subr.bf16.mxu1 %v897_v35 }
  0x38   :  { %808 = vmatpush3.bf16.msra.mxu1 %v898_v36 }
  0x39   :  { %809 = vmatprep.subr.bf16.mxu1 %v899_v37 }
  0x3c   :  { %810 = vmatpush3.bf16.msra.mxu1 %v900_v38 }
  0x3d   :  { %849 = vmatprep.subr.bf16.mxu1 %v939_v39 }
  0xea   :  { %v133_v47 = vpop.f32.mrb[0].mxu1 }
  0xeb   :  { %v134_v48 = vadd.f32 %v133_v47, %v58_v45  ;;  %v135_v49 = vpop.f32.mrb[1].mxu1 }
  0xec   :  { %v136_v51 = vadd.f32 %v135_v49, %v62_v46  ;;  %v137_v52 = vpop.f32.mrb[2].mxu1 }
  0xed   :  { %v181_v54 = vmax.f32 %v134_v48, 0.0  ;;  %v138_v55 = vpop.f32.mrb[3].mxu1 }
  0xee   :  { %v182_v56 = vmax.f32 %v136_v51, 0.0 }
  0xef   :  { %v185_v61 = vpack.c.bf16 %v181_v54, %v181_v54 }
  0xf0   :  { %v186_v58 = vpack.c.bf16 %v182_v56, %v182_v56 }
  0xf2   :  { %v174_v62 = vpop.f32.mrb[4].mxu1  ;;  %484 = vmatprep.mubr.bf16.mxu0 %v186_v58 }
  0xf3   :  { %v175_v63 = vadd.f32 %v174_v62, %v66_v57  ;;  %v176_v0 = vpop.f32.mrb[5].mxu1  ;;  %485 = vmatmul.mubr.bf16.vlgmr.msra.gmra.mrb[0].mxu0 %v185_v61 }
  0xf4   :  { %v177_v1 = vadd.f32 %v176_v0, %v70_v59  ;;  %v178_v2 = vpop.f32.mrb[6].mxu1  ;;  %830 = vmatpush3.bf16.msra.mxu0 %v901_v60  ;;  %845 = vmatprep.mubr.msk.bf16.mxu0 %vm940_vm1, %v939_v39 }
  0xf5   :  { %v183_v4 = vmax.f32 %v175_v63, 0.0  ;;  %v179_v5 = vpop.f32.mrb[7].mxu1  ;;  %831 = vmatprep.subr.bf16.mxu0 %v939_v39 }
  0xf6   :  { %v184_v6 = vmax.f32 %v177_v1, 0.0 }
  0xf7   :  { %v187_v9 = vpack.c.bf16 %v183_v4, %v183_v4 }
  0xf8   :  { %v188_v7 = vpack.c.bf16 %v184_v6, %v184_v6  ;;  %832 = vmatpush3.bf16.msra.mxu0 %v902_v3 }
  0xf9   :  { %833 = vmatprep.subr.bf16.mxu0 %v939_v39 }
  0xfa   :  { %524 = vmatprep.mubr.bf16.mxu1 %v188_v7 }
  0xfb   :  { %525 = vmatmul.mubr.bf16.vlgmr.msra.gmra.mrb[8].mxu1 %v187_v9 }
  0xfc   :  { %834 = vmatpush3.bf16.msra.mxu0 %v903_v8  ;;  %853 = vmatprep.mubr.msk.bf16.mxu1 %vm940_vm1, %v939_v39 }
  0xfd   :  { %835 = vmatprep.subr.bf16.mxu0 %v939_v39  ;;  %850 = vmatpush3.bf16.msra.mxu1 %v909_v30 }
  0xfe   :  { %851 = vmatprep.subr.bf16.mxu1 %v939_v39 }
 0x100   :  { %836 = vmatpush3.bf16.msra.mxu0 %v904_v10 }
 0x101   :  { %837 = vmatprep.subr.bf16.mxu0 %v939_v39  ;;  %852 = vmatpush3.bf16.msra.mxu1 %v910_v31 }
 0x104   :  { %838 = vmatpush3.bf16.msra.mxu0 %v905_v11 }
 0x105   :  { %839 = vmatprep.subr.bf16.mxu0 %v939_v39 }
 0x108   :  { %840 = vmatpush3.bf16.msra.mxu0 %v906_v12 }
 0x109   :  { %841 = vmatprep.subr.bf16.mxu0 %v939_v39 }
 0x10c   :  { %842 = vmatpush3.bf16.msra.mxu0 %v907_v13 }
 0x10d   :  { %843 = vmatprep.subr.bf16.mxu0 %v939_v39  ;;  %v769_v39 = vld [vmem:[%s1085_s8] ss:$0 sm:$0xff] }
 0x110   :  { %844 = vmatpush3.bf16.msra.mxu0 %v908_v14 }
 0x1c6   :  { %v789_v15 = vpop.f32.mrb[0].mxu0 }
 0x1c7   :  { %v790_v16 = vpop.f32.mrb[1].mxu0 }
 0x1c8   :  { %v791_v17 = vadd.f32 %v790_v16, %v789_v15  ;;  %v792_v18 = vpop.f32.mrb[2].mxu0 }
 0x1c9   :  { %v793_v19 = vpop.f32.mrb[3].mxu0 }
 0x1ca   :  { %v487_v23 = vadd.f32 %v791_v17, %v727_v20 }
 0x1ce   :  { %v811_v21 = vpop.f32.mrb[8].mxu1 }
 0x1cf   :  { %v812_v22 = vpop.f32.mrb[9].mxu1 }
 0x1d0   :  { %v813_v24 = vadd.f32 %v812_v22, %v811_v21  ;;  %v814_v25 = vpop.f32.mrb[10].mxu1 }
 0x1d1   :  { %v815_v26 = vpop.f32.mrb[11].mxu1 }
 0x1d2   :  { %v527_v27 = vadd.f32 %v813_v24, %v487_v23 }
 0x1d4   :  { %v532_v28 = vmax.f32 %v527_v27, 0.0 }
 0x1d6   :  { %v533_v29 = vpack.c.bf16 %v532_v28, %v532_v28 }
 0x1d8   :  { %846 = vmatmul.mubr.bf16.vlgmr.msra.gmra.mrb[4].mxu0 %v533_v29 }
 0x2ab   :  { %v639_v33 = vpop.f32.mrb[4].mxu0 }
 0x2ac   :  { %v640_v34 = vadd.f32 %v760_v32, %v639_v33  ;;  %v847_v35 = vpop.f32.mrb[5].mxu0 }
 0x2ad   :  { %v642_v36 = vpop.f32.mrb[6].mxu0 }
 0x2ae   :  { %v645_v37 = vmax.f32 %v640_v34, 0.0  ;;  %v848_v38 = vpop.f32.mrb[7].mxu0 }
 0x2b0   :  { %v646_v40 = vpack.c.bf16 %v645_v37, %v645_v37 }
 0x2b2   :  { %854 = vmatmul.mubr.msk.bf16.vlgmr.msra.gmra.mrb[12].mxu1 %vm670_vm2, %v646_v40 }
 0x385   :  { %v708_v41 = vpop.f32.mrb[12].mxu1 }
 0x386   :  { %v709_v42 = vadd.f32 %v769_v39, %v708_v41  ;;  %v855_v43 = vpop.f32.mrb[13].mxu1 }
 0x387   :  { %v711_v44 = vpop.f32.mrb[14].mxu1 }
 0x388   :  { %715 = vst.msk [vmem:[%s1086_s9] sm:$0xff] %vm714_vm3, %v709_v42  ;;  %v856_v45 = vpop.f32.mrb[15].mxu1 }
 0x389   :  { %720 = vsyncpa [#allocation3], 1 }

</bundles_post_ra>
